<compile_context>
chip_gen: v5e
topology: v5e:2x2
jax: 0.10.0
libtpu: 0.0.40
codegen_flags: <defaults>
</compile_context>

<pallas_src>
import functools

import jax
import jax.numpy as jnp
from jax.experimental import pallas as pl
from jax.experimental.pallas import tpu as pltpu

NUM_CLASSES = 2     # real logits
OUT_PAD = 128       # lane-dense output width
HIDDEN = 128
F_BEH = 192
F_TXT = 256
IN_FEATURES = F_BEH + F_TXT   # 448


def _round_up(n, m):
    return ((n + m - 1) // m) * m


def _fake_reviewer_kernel(beh_ref, txt_ref, wb_ref, wt_ref, b_ref, out_ref,
                          *, num_classes):
    # Folded eval-mode network:
    #   logits = [behavior, text] @ (W1 @ W2) + (b1 @ W2 + b2)
    # Split over the concat axis so no wrapper-side concatenation is needed.
    # Activations arrive f32 and are cast to bf16 right before the MXU;
    # accumulation is f32.
    logits = jnp.dot(beh_ref[...].astype(jnp.bfloat16), wb_ref[...],
                     preferred_element_type=jnp.float32)
    logits = logits + jnp.dot(txt_ref[...].astype(jnp.bfloat16), wt_ref[...],
                              preferred_element_type=jnp.float32)
    logits = logits + b_ref[...]

    # dropout_4 (p=0.5): identity at inference time.
    # TODO(synk): training-mode stochastic dropout not implemented (and the
    #             layer fold above is only valid for eval-mode semantics).

    # Mask padded class columns with a large finite negative (exp underflows to
    # 0, no inf/NaN risk) so they do not pollute the softmax denominator.
    col = jax.lax.broadcasted_iota(jnp.int32, logits.shape, 1)
    logits = jnp.where(col < num_classes, logits, jnp.float32(-1e30))

    # Numerically-stable softmax over the class axis (dim=1), exact division.
    m = jnp.max(logits, axis=-1, keepdims=True)
    e = jnp.exp(logits - m)
    denom = jnp.sum(e, axis=-1, keepdims=True)
    out_ref[...] = (e / denom).astype(out_ref.dtype)


def fake_reviewer_detection(behavior_features, text_features, w1, b1, w2, b2,
                            *, tb=2048):
    """behavior: (B,192), text: (B,256); w1: (448,128), b1: (128,),
    w2: (128,2), b2: (2,). Returns softmax probabilities (B, 2) in f32."""
    B = behavior_features.shape[0]

    # Batch tile: as large as reasonable (amortizes ~0.35us/step overhead) but
    # guarantee >= 4 grid steps for large B so both v7x TensorCores stream.
    tb = min(tb, _round_up(max(-(-B // 4), 1), 8))
    grid = (pl.cdiv(B, tb),)   # ragged last block handled by Pallas, no jnp.pad

    # Eval-mode fold of the two Linear layers (computed in f32 in the wrapper).
    w1f = w1.astype(jnp.float32)
    w2f = w2.astype(jnp.float32)
    w_eff = jnp.dot(w1f, w2f)                                   # (448, 2)
    b_eff = jnp.dot(b1.astype(jnp.float32), w2f) + b2.astype(jnp.float32)  # (2,)

    # Lane-dense zero-padded weight slab (bf16 for the MXU), pre-split along
    # the concat axis; f32 bias row.
    w_eff_pad = jnp.zeros((IN_FEATURES, OUT_PAD), jnp.bfloat16)
    w_eff_pad = w_eff_pad.at[:, :NUM_CLASSES].set(w_eff.astype(jnp.bfloat16))
    wb = w_eff_pad[:F_BEH]                                      # (192, 128)
    wt = w_eff_pad[F_BEH:]                                      # (256, 128)
    b_eff_row = jnp.zeros((1, OUT_PAD), jnp.float32).at[:, :NUM_CLASSES].set(
        b_eff.reshape(1, NUM_CLASSES))

    # VMEM-limit guard (mainly for v5e's 16 MiB default scoped VMEM when tb is
    # swept upward). Double-buffered input/output tiles + resident weights.
    in_bytes = jnp.dtype(behavior_features.dtype).itemsize
    vmem_need = (2 * tb * IN_FEATURES * in_bytes      # activation tiles (x2 buf)
                 + 2 * tb * OUT_PAD * 2               # bf16 output tile (x2 buf)
                 + 2 * IN_FEATURES * OUT_PAD * 2      # weight slabs
                 + 2 * OUT_PAD * 4)                   # bias row
    vmem_limit = None
    if vmem_need > 12 * 1024 * 1024:
        vmem_limit = min(2 * vmem_need, 64 * 1024 * 1024)

    grid_spec = pl.GridSpec(
        grid=grid,
        in_specs=[
            pl.BlockSpec((tb, F_BEH), lambda i: (i, 0)),        # behavior tile
            pl.BlockSpec((tb, F_TXT), lambda i: (i, 0)),        # text tile
            pl.BlockSpec((F_BEH, OUT_PAD), lambda i: (0, 0)),   # W_eff[:192]  (resident)
            pl.BlockSpec((F_TXT, OUT_PAD), lambda i: (0, 0)),   # W_eff[192:]  (resident)
            pl.BlockSpec((1, OUT_PAD), lambda i: (0, 0)),       # b_eff        (resident)
        ],
        out_specs=pl.BlockSpec((tb, OUT_PAD), lambda i: (i, 0)),
    )

    flops = 2 * B * IN_FEATURES * OUT_PAD
    bytes_accessed = (B * IN_FEATURES * in_bytes       # activations in
                      + IN_FEATURES * OUT_PAD * 2      # folded weights (bf16)
                      + OUT_PAD * 4                    # bias (f32)
                      + B * OUT_PAD * 2)               # bf16 output slab
    cost = pl.CostEstimate(flops=flops,
                           transcendentals=B * OUT_PAD,
                           bytes_accessed=bytes_accessed)

    out_pad = pl.pallas_call(
        functools.partial(_fake_reviewer_kernel, num_classes=NUM_CLASSES),
        out_shape=jax.ShapeDtypeStruct((B, OUT_PAD), jnp.bfloat16),
        grid_spec=grid_spec,
        compiler_params=pltpu.CompilerParams(
            dimension_semantics=("parallel",),
            vmem_limit_bytes=vmem_limit),
        cost_estimate=cost,
    )(behavior_features, text_features, wb, wt, b_eff_row)

    # Slice back to the real class extent; return f32 probabilities.
    return out_pad[:, :NUM_CLASSES].astype(jnp.float32)


def _init_params(key):
    """PyTorch-Linear-style init: U(-1/sqrt(fan_in), 1/sqrt(fan_in))."""
    k1, k2, k3, k4 = jax.random.split(key, 4)
    lim1 = 1.0 / jnp.sqrt(448.0)
    lim2 = 1.0 / jnp.sqrt(128.0)
    w1 = jax.random.uniform(k1, (448, 128), jnp.float32, -lim1, lim1)
    b1 = jax.random.uniform(k2, (128,), jnp.float32, -lim1, lim1)
    w2 = jax.random.uniform(k3, (128, 2), jnp.float32, -lim2, lim2)
    b2 = jax.random.uniform(k4, (2,), jnp.float32, -lim2, lim2)
    return w1, b1, w2, b2


if __name__ == "__main__":
    key = jax.random.PRNGKey(0)
    k_params, k_beh, k_txt = jax.random.split(key, 3)

    # B not a multiple of the batch tile: exercises the ragged last block.
    B = 10
    behavior_features = jax.random.normal(k_beh, (B, F_BEH), jnp.float32)
    text_features = jax.random.normal(k_txt, (B, F_TXT), jnp.float32)

    w1, b1, w2, b2 = _init_params(k_params)

    out = fake_reviewer_detection(behavior_features, text_features,
                                  w1, b1, w2, b2)
    out = jax.block_until_ready(out)

    # Pure-JAX f32 reference (eval-mode semantics). Kernel uses bf16 MXU inputs
    # and a bf16 output slab, so compare with a correspondingly loose tolerance.
    x = jnp.concatenate([behavior_features, text_features], axis=1)
    ref = jax.nn.softmax(jnp.dot(jnp.dot(x, w1) + b1, w2) + b2, axis=1)

    assert out.shape == (B, NUM_CLASSES)
    assert jnp.allclose(out, ref, atol=2e-2, rtol=2e-2), (
        f"max abs err {jnp.max(jnp.abs(out - ref))}")
    # Exact in-kernel division; only bf16 output rounding perturbs the sum.
    assert jnp.allclose(jnp.sum(out, axis=1), 1.0, atol=1e-2)

    print("KERNEL_OK")
</pallas_src>

<mosaic_0001>
module attributes {stable_mosaic.version = 11 : i64} {
  func.func @_fake_reviewer_kernel(%arg0: i32, %arg1: memref<8x192xf32, #tpu.memory_space<vmem>>, %arg2: memref<8x256xf32, #tpu.memory_space<vmem>>, %arg3: memref<192x128xbf16, #tpu.memory_space<vmem>>, %arg4: memref<256x128xbf16, #tpu.memory_space<vmem>>, %arg5: memref<1x128xf32, #tpu.memory_space<vmem>>, %arg6: memref<8x128xbf16, #tpu.memory_space<vmem>>) attributes {dimension_semantics = [#tpu.dimension_semantics<parallel>], iteration_bounds = array<i64: 2>, scalar_prefetch = 0 : i64, scratch_operands = 0 : i64, tpu.core_type = #tpu.core_type<tc>, window_params = [{transform_indices = @transform_0, window_bounds = array<i64: 8, 192>}, {transform_indices = @transform_1, window_bounds = array<i64: 8, 256>}, {pipeline_mode = #tpu.pipeline_mode<synchronous>, transform_indices = @transform_2, window_bounds = array<i64: 192, 128>}, {pipeline_mode = #tpu.pipeline_mode<synchronous>, transform_indices = @transform_3, window_bounds = array<i64: 256, 128>}, {pipeline_mode = #tpu.pipeline_mode<synchronous>, transform_indices = @transform_4, window_bounds = array<i64: 1, 128>}, {transform_indices = @transform_5, window_bounds = array<i64: 8, 128>}]} {
    %c0 = arith.constant 0 : index
    %c0_0 = arith.constant 0 : index
    %0 = vector.load %arg1[%c0, %c0_0] : memref<8x192xf32, #tpu.memory_space<vmem>>, vector<8x192xf32>
    %1 = arith.truncf %0 : vector<8x192xf32> to vector<8x192xbf16>
    %c0_1 = arith.constant 0 : index
    %c0_2 = arith.constant 0 : index
    %2 = vector.load %arg3[%c0_1, %c0_2] : memref<192x128xbf16, #tpu.memory_space<vmem>>, vector<192x128xbf16>
    %cst = arith.constant dense<0.000000e+00> : vector<8x128xf32>
    %3 = tpu.matmul %1, %2, %cst {dimension_numbers = #tpu.dot_dimension_numbers<[1], [0], [0], [1], [0, 0, 1, 1], [], []>} : vector<8x192xbf16>, vector<192x128xbf16>, vector<8x128xf32> -> vector<8x128xf32>
    %c0_3 = arith.constant 0 : index
    %c0_4 = arith.constant 0 : index
    %4 = vector.load %arg2[%c0_3, %c0_4] : memref<8x256xf32, #tpu.memory_space<vmem>>, vector<8x256xf32>
    %5 = arith.truncf %4 : vector<8x256xf32> to vector<8x256xbf16>
    %c0_5 = arith.constant 0 : index
    %c0_6 = arith.constant 0 : index
    %6 = vector.load %arg4[%c0_5, %c0_6] : memref<256x128xbf16, #tpu.memory_space<vmem>>, vector<256x128xbf16>
    %cst_7 = arith.constant dense<0.000000e+00> : vector<8x128xf32>
    %7 = tpu.matmul %5, %6, %cst_7 {dimension_numbers = #tpu.dot_dimension_numbers<[1], [0], [0], [1], [0, 0, 1, 1], [], []>} : vector<8x256xbf16>, vector<256x128xbf16>, vector<8x128xf32> -> vector<8x128xf32>
    %8 = arith.addf %3, %7 : vector<8x128xf32>
    %c0_8 = arith.constant 0 : index
    %c0_9 = arith.constant 0 : index
    %9 = vector.load %arg5[%c0_8, %c0_9] : memref<1x128xf32, #tpu.memory_space<vmem>>, vector<1x128xf32>
    %10 = vector.broadcast %9 : vector<1x128xf32> to vector<8x128xf32>
    %11 = arith.addf %8, %10 : vector<8x128xf32>
    %12 = tpu.iota {dimensions = array<i32: 1>} : vector<8x128xi32>
    %c2_i32 = arith.constant 2 : i32
    %13 = vector.broadcast %c2_i32 : i32 to vector<8x128xi32>
    %14 = arith.cmpi slt, %12, %13 : vector<8x128xi32>
    %cst_10 = arith.constant -1.000000e+30 : f32
    %15 = vector.broadcast %cst_10 : f32 to vector<8x128xf32>
    %16 = arith.select %14, %11, %15 : vector<8x128xi1>, vector<8x128xf32>
    %cst_11 = arith.constant dense<0xFF800000> : vector<8xf32>
    %17 = vector.multi_reduction <maximumf>, %16, %cst_11 [1] : vector<8x128xf32> to vector<8xf32>
    %18 = vector.shape_cast %17 : vector<8xf32> to vector<8x1xf32>
    %19 = vector.broadcast %18 : vector<8x1xf32> to vector<8x128xf32>
    %20 = arith.subf %16, %19 : vector<8x128xf32>
    %21 = math.exp %20 : vector<8x128xf32>
    %cst_12 = arith.constant dense<0.000000e+00> : vector<8xf32>
    %22 = vector.multi_reduction <add>, %21, %cst_12 [1] : vector<8x128xf32> to vector<8xf32>
    %23 = vector.shape_cast %22 : vector<8xf32> to vector<8x1xf32>
    %24 = vector.broadcast %23 : vector<8x1xf32> to vector<8x128xf32>
    %25 = arith.divf %21, %24 : vector<8x128xf32>
    %26 = arith.truncf %25 : vector<8x128xf32> to vector<8x128xbf16>
    %c0_13 = arith.constant 0 : index
    %c0_14 = arith.constant 0 : index
    %27 = vector.load %arg6[%c0_13, %c0_14] : memref<8x128xbf16, #tpu.memory_space<vmem>>, vector<8x128xbf16>
    tpu.vector_store %arg6[%c0_13, %c0_14], %26 {strides = array<i32>} : memref<8x128xbf16, #tpu.memory_space<vmem>>, vector<8x128xbf16>,
    return
  }
  func.func @transform_0(%arg0: i32) -> (i32, i32) {
    %c0_i32 = arith.constant 0 : i32
    %c0_i32_0 = arith.constant 0 : i32
    return %arg0, %c0_i32 : i32, i32
  }
  func.func @transform_1(%arg0: i32) -> (i32, i32) {
    %c0_i32 = arith.constant 0 : i32
    %c0_i32_0 = arith.constant 0 : i32
    return %arg0, %c0_i32 : i32, i32
  }
  func.func @transform_2(%arg0: i32) -> (i32, i32) {
    %c0_i32 = arith.constant 0 : i32
    %c0_i32_0 = arith.constant 0 : i32
    %c0_i32_1 = arith.constant 0 : i32
    return %c0_i32, %c0_i32_0 : i32, i32
  }
  func.func @transform_3(%arg0: i32) -> (i32, i32) {
    %c0_i32 = arith.constant 0 : i32
    %c0_i32_0 = arith.constant 0 : i32
    %c0_i32_1 = arith.constant 0 : i32
    return %c0_i32, %c0_i32_0 : i32, i32
  }
  func.func @transform_4(%arg0: i32) -> (i32, i32) {
    %c0_i32 = arith.constant 0 : i32
    %c0_i32_0 = arith.constant 0 : i32
    %c0_i32_1 = arith.constant 0 : i32
    return %c0_i32, %c0_i32_0 : i32, i32
  }
  func.func @transform_5(%arg0: i32) -> (i32, i32) {
    %c0_i32 = arith.constant 0 : i32
    %c0_i32_0 = arith.constant 0 : i32
    return %arg0, %c0_i32 : i32, i32
  }
}

</mosaic_0001>

<bundles_post_ra>
// kernel: tpu_custom_call.1
= control target key start
LH: loop header
LB: loop body
LE: loop exit
PB: predicated region body
PF: predicated region fallthrough
CT: control target
= control target key end

     0   :  { %s1431_s0 = inlined_call_operand.hbm [shape: f32[10,192], index: 0, kind: input, shape index: {}]   ;;  %s1432_s1 = inlined_call_operand.hbm [shape: f32[10,256], index: 1, kind: input, shape index: {}]   ;;  %s1433_s2 = inlined_call_operand.hbm [shape: bf16[192,128], index: 2, kind: input, shape index: {}]   ;;  %s1434_s3 = inlined_call_operand.hbm [shape: bf16[256,128], index: 3, kind: input, shape index: {}]   ;;  %s1435_s4 = inlined_call_operand.vmem [shape: f32[1,128], index: 4, kind: input, shape index: {}]   ;;  %s1436_s5 = inlined_call_operand.hbm [shape: bf16[10,128], index: 5, kind: output, shape index: {}]  }
   0x1   :  { %1438 = sst [smem:[#allocation18_spill]] %s1433_s2 }
   0x2   :  { %1439 = sst [smem:[#allocation19_spill]] %s1434_s3 }
   0x3   :  { %10 = vsyncpa [#allocation3], 0 }
   0x4   :  { %12 = vsyncpa [#allocation3 + $0x1], 0 }
   0x5   :  { %13 = vsyncpa [#allocation6], 0 }
   0x6   :  { %15 = vsyncpa [#allocation6 + $0x1], 0 }
   0x7   :  { %16 = vsyncpa [#allocation9], 0 }
   0x8   :  { %17 = vsyncpa [#allocation4], 0 }
   0x9   :  { %19 = vsyncpa [#allocation4 + $0x1], 0  ;;  %s1243_s18 = smov 0   ;;  %s1245_s19 = smov 0  }
   0xa   :  { %s1247_s20 = smov 0   ;;  %s1249_s21 = smov 0  }
   0xb LB: > { %1440 = sst [smem:[#allocation16_spill]] %s1203_s20  ;;  %s1267_s25 = sadd.s32 4294967295, %s1207_s21   ;;  %s1207_s21 = sphi %s1249_s21, %s1455_s21   ;;  %s1203_s20 = sphi %s1247_s20, %s1452_s20   ;;  %s1199_s19 = sphi %s1245_s19, %s1454_s19   ;;  %s1195_s18 = sphi %s1243_s18, %s1453_s18  }
   0xc   : > { %s1441_s2 = sld [smem:[#allocation18_spill]]  ;;  %p767_p0 = scmp.ge.s32.totalorder %s1207_s21, 1 }
   0xd   : > { %p46_p1 = scmp.eq.s32.totalorder %s1267_s25, 0  ;;  %p171_p2 = scmp.lt.s32.totalorder %s1207_s21, 3 }
   0xe   : > { %s1209_s27 = smov [#allocation7]   ;;  %s1443_s3 = sld [smem:[#allocation19_spill]] }
   0xf   : > { %p1272_p3 = pnand %p767_p0, %p171_p2  ;;  %s184_s28 = sshll.u32 %s1209_s27, 4  ;;  %s185_s28 = int_to_ptr.vmem [resolvable:$true] %s184_s28 }
  0x10   : > { %s1210_s7 = smov [#allocation8]   ;;  %s1211_s9 = smov 64  }
  0x11   : > { %p944_p4 = pneg %p1272_p3  ;;  %s198_s8 = sshll.u32 %s1210_s7, 4  ;;  %s199_s8 = int_to_ptr.vmem [resolvable:$true] %s198_s8 }
  0x12   : > { %s182_s24 = sshll.u32 %s1441_s2, 4  ;;  %s1212_s10 = smov 4   ;;  %s183_s24 = int_to_ptr.hbm [resolvable:$true] %s182_s24 }
  0x13   : > { %p945_p6 = pnand %p944_p4, %p46_p1  ;;  %s766_s11 = sadd.s32 4294967294, %s1207_s21  }
  0x14   : > { %s196_s6 = sshll.u32 %s1443_s3, 4  ;;  %s1286_s12 = sadd.s32 1, %s1207_s21   ;;  %s197_s6 = int_to_ptr.hbm [resolvable:$true] %s196_s6 }
  0x15   : > { %947 = dma.hbm_to_vmem [thread:$0]  (!%p945_p6), %s183_s24, 1536, %s185_s28, [#allocation6], %s1211_s9, %s1211_s9, %s1212_s10  }
  0x16   : > { %950 = dma.hbm_to_vmem [thread:$0]  (!%p945_p6), %s197_s6, 2048, %s199_s8, [#allocation9], %s1211_s9, %s1211_s9, %s1212_s10  }
  0x17   : > { %s29_s13 = ssub.s32 %s1207_s21, %s1286_s12  ;;  %s32_s14 = sadd.s32 1, %s1203_s20 }
  0x18   : > { %p30_p7 = scmp.eq.s32.totalorder %s29_s13, 0  ;;  %p39_p8 = scmp.ne.s32.totalorder %s1203_s20, %s1199_s19 }
  0x19   : > { %p40_p9 = scmp.eq.s32.totalorder %s1207_s21, 0  ;;  %p45_p10 = scmp.ne.s32.totalorder %s1199_s19, %s1195_s18 }
  0x1a   : > { %s1297_s15 = scalar_select %p30_p7, %s1203_s20, %s32_s14  }
  0x1b   : > { %p1299_p11 = por %p40_p9, %p39_p8  ;;  %p1305_p12 = por %p46_p1, %p45_p10 }
  0x1c   : > { %1444 = sst [smem:[#allocation17_spill]] %s1297_s15  ;;  %p158_p13 = scmp.eq.s32.totalorder %s1267_s25, 1 }
  0x1d   : > { %p164_p0 = scmp.eq.s32.totalorder %s766_s11, 1  ;;  %p964_p2 = scmp.lt.s32.totalorder %s1207_s21, 2 }
  0x1e   : > { %s215_s22 = sand.u32 1, %s1203_s20   ;;  %p1312_p4 = por %p158_p13, %p39_p8 }
  0x1f   : > { %p1316_p6 = por %p164_p0, %p45_p10  ;;  %s1320_s27 = sshll.u32 %s215_s22, 4 }
  0x20   : > { %s900_s28 = sshll.u32 %s1207_s21, 4  ;;  %s219_s7 = scalar_lea.vmem [#allocation2], %s1320_s27 }
  0x21   : > { %s224_s6 = scalar_lea.hbm %s1431_s0, %s900_s28  ;;  %s228_s8 = sshll.u32 %s219_s7, 4  ;;  %s229_s8 = int_to_ptr.vmem [resolvable:$true] %s228_s8 }
  0x22   : > { %s226_s9 = sshll.u32 %s224_s6, 4  ;;  %p1329_p7 = pnand %p964_p2, %p1299_p11  ;;  %s227_s9 = int_to_ptr.hbm [resolvable:$true] %s226_s9 }
  0x23   : > { %s244_s14 = scalar_lea.hbm %s1432_s1, %s900_s28  ;;  %s235_s2 = sand.u32 1, %s1207_s21  }
  0x24   : > { %s216_s3 = scalar_lea.sflag [#allocation3], %s215_s22  ;;  %s1069_s29 = sshra.s32 %s227_s9, 4  ;;  %s1070_s29 = int_to_ptr.hbm [resolvable:$true] %s1069_s29 }
  0x25   : > { %s1071_s30 = scalar_lea.hbm %s1070_s29, 16  ;;  %p1073_p9 = pneg %p1329_p7 }
  0x26   : > { %p1072_p8 = scmp.ne.s32.totalorder %s1070_s29, %s1071_s30  ;;  %s1076_s7 = scalar_lea.hbm %s1431_s0, 32 }
  0x27   : > { %p1077_p13 = scmp.lt.s32.totalorder %s1070_s29, %s1431_s0  ;;  %p1078_p0 = scmp.lt.s32.totalorder %s1076_s7, %s1071_s30 }
  0x28   : > { %p1074_p10 = pnand %p1073_p9, %p1072_p8 }
  0x29   : > { %p1079_p2 = por %p1078_p0, %p1077_p13 }
  0x2a   : > { %p1075_p11 = pneg %p1074_p10 }
  0x2c   : > { %p1080_p5 = pnand %p1079_p2, %p1075_p11 }
  0x2e   : > { %1083 = shalt.err (!%p1080_p5)
}
  0x2f   : > { %954 = dma.hbm_to_vmem [thread:$0]  (!%p1329_p7), %s227_s9, 256, %s229_s8, %s216_s3  }
  0x30   : > { %s246_s22 = sshll.u32 %s244_s14, 4  ;;  %s239_s28 = scalar_lea.vmem [#allocation5], %s1320_s27  ;;  %s247_s22 = int_to_ptr.hbm [resolvable:$true] %s246_s22 }
  0x31   : > { %s248_s15 = sshll.u32 %s239_s28, 4  ;;  %s236_s16 = scalar_lea.sflag [#allocation6], %s235_s2  ;;  %s249_s15 = int_to_ptr.vmem [resolvable:$true] %s248_s15 }
  0x32   : > { %s1099_s6 = sshra.s32 %s247_s22, 4  ;;  %s1106_s7 = scalar_lea.hbm %s1432_s1, 32  ;;  %s1100_s6 = int_to_ptr.hbm [resolvable:$true] %s1099_s6 }
  0x33   : > { %s1101_s20 = scalar_lea.hbm %s1100_s6, 16  ;;  %p1107_p5 = scmp.lt.s32.totalorder %s1100_s6, %s1432_s1 }
  0x34   : > { %p1102_p8 = scmp.ne.s32.totalorder %s1100_s6, %s1101_s20  ;;  %p1108_p13 = scmp.lt.s32.totalorder %s1106_s7, %s1101_s20 }
  0x36   : > { %p1104_p10 = pnand %p1102_p8, %p1073_p9  ;;  %p1109_p0 = por %p1108_p13, %p1107_p5 }
  0x38   : > { %p1105_p11 = pneg %p1104_p10 }
  0x3a   : > { %p1110_p2 = pnand %p1109_p0, %p1105_p11 }
  0x3c   : > { %1113 = shalt.err (!%p1110_p2)
}
  0x3d   : > { %957 = dma.hbm_to_vmem [thread:$0]  (!%p1329_p7), %s247_s22, 256, %s249_s15, %s236_s16  }
  0x3e   : > { %257 = sbr.rel (%p1272_p3) target bundleno = 515 (0x203), region = 40  ;;  %s1365_s2 = sand.u32 (!%p1272_p3), 1, %s1199_s19  }
  0x3f   : > { %s778_s27 = sshll.u32 (!%p1272_p3), %s1365_s2, 4  ;;  %s260_s8 = scalar_lea.sflag (!%p1272_p3), [#allocation3], %s1365_s2 }
  0x40   : > { %s1369_s9 = scalar_lea.vmem (!%p1272_p3), [#allocation2], %s778_s27 }
  0x43   : > { %1174 = dma.done.wait (%p1305_p12), %s260_s8, 256  }
  0x44   : > { %1176 = vsyncadd (%p1305_p12), %s260_s8, 4294967040  ;;  %s269_s20 = sand.u32 1, %s1267_s25   ;;  %s1376_s15 = scalar_lea.vmem [#allocation5], %s778_s27 }
  0x45   : > { %s270_s26 = scalar_lea.sflag [#allocation6], %s269_s20 }
  0x46   : > { %1178 = dma.done.wait (%p1305_p12), %s270_s26, 256  }
  0x47   : > { %1180 = vsyncadd (%p1305_p12), %s270_s26, 4294967040 }
  0x48   : > { %1182 = dma.done.wait (%p46_p1), [#allocation6], 1536  }
  0x49   : > { %1184 = vsyncadd (%p46_p1), [#allocation6], 4294965760 }
  0x4a   : > { %1186 = dma.done.wait (%p46_p1), [#allocation9], 2048  }
  0x4b   : > { %1188 = vsyncadd (%p46_p1), [#allocation9], 4294965248  ;;  %v921_v0 = vld [vmem:[#allocation8 + $0x38] sm:$0xff]  ;;  %v920_v3 = vld [vmem:[#allocation8 + $0x30] sm:$0xff]  ;;  %vm575_vm0 = vcmask 523264   ;;  %v610_v40 = vlaneseq  ;;  %s782_s14 = sshll.u32 %s1365_s2, 2 }
  0x4c   : > { %v929_v1 = vld [vmem:[#allocation8 + $0x78] sm:$0xff]  ;;  %477 = vmatpush.bf16.msra.mxu0 %v921_v0  ;;  %v928_v4 = vld [vmem:[#allocation8 + $0x70] sm:$0xff]  ;;  %v919_v8 = vld [vmem:[#allocation8 + $0x28] sm:$0xff]  ;;  %s897_s13 = sshll.u32 %s1267_s25, 2  ;;  %s315_s6 = scalar_lea.vmem [#allocation10], %s782_s14 }
  0x4d   : > { %v909_v2 = vld [vmem:[#allocation7 + $0x38] sm:$0xff]  ;;  %490 = vmatpush.bf16.msra.mxu1 %v929_v1  ;;  %v908_v5 = vld [vmem:[#allocation7 + $0x30] sm:$0xff]  ;;  %v927_v9 = vld [vmem:[#allocation8 + $0x68] sm:$0xff]  ;;  %v611_v43 = vand.u32 127, %v610_v40  ;;  %s649_s16 = scalar_lea.hbm %s1436_s5, %s897_s13  ;;  %s651_s29 = sshll.u32 %s315_s6, 4  ;;  %s652_s29 = int_to_ptr.vmem [resolvable:$true] %s651_s29 }
  0x4e   : > { %579 = vmatpush.bf16.msra.mxu2 %v909_v2  ;;  %v913_v6 = vld [vmem:[#allocation7 + $0x58] sm:$0xff]  ;;  %v912_v7 = vld [vmem:[#allocation7 + $0x50] sm:$0xff]  ;;  %v907_v10 = vld [vmem:[#allocation7 + $0x28] sm:$0xff]  ;;  %s653_s30 = sshll.u32 %s649_s16, 4  ;;  %s639_s25 = scalar_lea.sflag [#allocation4], %s1365_s2  ;;  %s654_s30 = int_to_ptr.hbm [resolvable:$true] %s653_s30 }
  0x4f   : > { %596 = vmatpush.bf16.msra.mxu3 %v913_v6  ;;  %v911_v11 = vld [vmem:[#allocation7 + $0x48] sm:$0xff]  ;;  %v918_v12 = vld [vmem:[#allocation8 + $0x20] sm:$0xff]  ;;  %v917_v17 = vld [vmem:[#allocation8 + $0x18] sm:$0xff]  ;;  %vm612_vm1 = vcmp.lt.s32.totalorder %v611_v43, 2  ;;  %s1143_s7 = sshra.s32 %s654_s30, 4  ;;  %s1149_s8 = scalar_lea.hbm %s1436_s5, 8  ;;  %s1144_s7 = int_to_ptr.hbm [resolvable:$true] %s1143_s7 }
  0x50   : > { %478 = vmatpush.bf16.msra.mxu0 %v920_v3  ;;  %v926_v13 = vld [vmem:[#allocation8 + $0x60] sm:$0xff]  ;;  %v318_v16 = vld [vmem:[%s1369_s9 + $0x8] sm:$0xff]  ;;  %v916_v21 = vld [vmem:[#allocation8 + $0x10] sm:$0xff]  ;;  %s1145_s11 = scalar_lea.hbm %s1144_s7, 4  ;;  %p1150_p7 = scmp.lt.s32.totalorder %s1144_s7, %s1436_s5 }
  0x51   : > { %491 = vmatpush.bf16.msra.mxu1 %v928_v4  ;;  %v906_v14 = vld [vmem:[#allocation7 + $0x20] sm:$0xff]  ;;  %v925_v18 = vld [vmem:[#allocation8 + $0x58] sm:$0xff]  ;;  %v320_v20 = vpack.c.bf16 %v318_v16, %v318_v16  ;;  %v924_v22 = vld [vmem:[#allocation8 + $0x50] sm:$0xff]  ;;  %p1146_p1 = scmp.ne.s32.totalorder %s1144_s7, %s1145_s11  ;;  %p1151_p9 = scmp.lt.s32.totalorder %s1149_s8, %s1145_s11 }
  0x52   : > { %580 = vmatpush.bf16.msra.mxu2 %v908_v5  ;;  %v910_v15 = vld [vmem:[#allocation7 + $0x40] sm:$0xff]  ;;  %v905_v19 = vld [vmem:[#allocation7 + $0x18] sm:$0xff]  ;;  %v904_v23 = vld [vmem:[#allocation7 + $0x10] sm:$0xff] }
  0x53   : > { %597 = vmatpush.bf16.msra.mxu3 %v912_v7  ;;  %v915_v24 = vld [vmem:[#allocation8 + $0x8] sm:$0xff]  ;;  %v914_v27 = vld [vmem:[#allocation8] sm:$0xff]  ;;  %p1147_p3 = pnand %p1146_p1, %p1312_p4  ;;  %p1152_p8 = por %p1151_p9, %p1150_p7 }
  0x54   : > { %479 = vmatpush.bf16.msra.mxu0 %v919_v8  ;;  %v923_v25 = vld [vmem:[#allocation8 + $0x48] sm:$0xff]  ;;  %v922_v28 = vld [vmem:[#allocation8 + $0x40] sm:$0xff] }
  0x55   : > { %492 = vmatpush.bf16.msra.mxu1 %v927_v9  ;;  %v903_v26 = vld [vmem:[#allocation7 + $0x8] sm:$0xff]  ;;  %v345_v29 = vld [vmem:[%s1376_s15] sm:$0xff]  ;;  %p1148_p12 = pneg %p1147_p3 }
  0x56   : > { %581 = vmatpush.bf16.msra.mxu2 %v907_v10  ;;  %v346_v30 = vld [vmem:[%s1376_s15 + $0x8] sm:$0xff]  ;;  %v902_v31 = vld [vmem:[#allocation7] sm:$0xff]  ;;  %v347_v33 = vpack.c.bf16 %v345_v29, %v345_v29 }
  0x57   : > { %598 = vmatpush.bf16.msra.mxu3 %v911_v11  ;;  %v317_v32 = vld [vmem:[%s1369_s9] sm:$0xff]  ;;  %v348_v34 = vpack.c.bf16 %v346_v30, %v346_v30  ;;  %p1153_p10 = pnand %p1152_p8, %p1148_p12 }
  0x58   : > { %480 = vmatpush.bf16.msra.mxu0 %v918_v12  ;;  %v319_v35 = vpack.c.bf16 %v317_v32, %v317_v32  ;;  %v1004_v47 = vld [vmem:[%s1435_s4] ss:$0 sm:$0xff] }
  0x59   : > { %493 = vmatpush.bf16.msra.mxu1 %v926_v13 }
  0x5a   : > { %582 = vmatpush.bf16.msra.mxu2 %v906_v14 }
  0x5b   : > { %599 = vmatpush.bf16.msra.mxu3 %v910_v15 }
  0x5c   : > { %481 = vmatpush.bf16.msra.mxu0 %v917_v17 }
  0x5d   : > { %494 = vmatpush.bf16.msra.mxu1 %v925_v18 }
  0x5e   : > { %583 = vmatpush.bf16.msra.mxu2 %v905_v19  ;;  %895 = vmatmul.msk.bf16.vlgmr.msra.gmra.mxu3 %vm575_vm0, %v320_v20 }
  0x60   : > { %482 = vmatpush.bf16.msra.mxu0 %v916_v21 }
  0x61   : > { %495 = vmatpush.bf16.msra.mxu1 %v924_v22 }
  0x62   : > { %584 = vmatpush.bf16.msra.mxu2 %v904_v23 }
  0x64   : > { %483 = vmatpush.bf16.msra.mxu0 %v915_v24 }
  0x65   : > { %496 = vmatpush.bf16.msra.mxu1 %v923_v25 }
  0x66   : > { %585 = vmatpush.bf16.msra.mxu2 %v903_v26 }
  0x68   : > { %484 = vmatpush.bf16.msra.mxu0 %v914_v27 }
  0x69   : > { %497 = vmatpush.bf16.msra.mxu1 %v922_v28 }
  0x6a   : > { %586 = vmatpush.bf16.msra.mxu2 %v902_v31 }
  0x6b   : > { %485 = vmatmul.bf16.vlgmr.msra.gmra.mxu0 %v347_v33 }
  0x6c   : > { %498 = vmatmul.bf16.vlgmr.msra.gmra.mxu1 %v348_v34 }
  0x6d   : > { %587 = vmatmul.bf16.vlgmr.msra.gmra.mxu2 %v319_v35 }
  0xe1   : > { %v601_v36 = vpop.f32.mrf.mxu3 }
  0xe8   : > { %v486_v37 = vpop.f32.mrf.mxu0 }
  0xe9   : > { %v499_v38 = vpop.f32.mrf.mxu1  ;;  %v603_v39 = vpop.f32.mrf.mxu3 }
  0xea   : > { %v500_v41 = vadd.f32 %v499_v38, %v486_v37 }
  0xf0   : > { %v588_v42 = vpop.f32.mrf.mxu2  ;;  %v488_v45 = vpop.f32.mrf.mxu0 }
  0xf1   : > { %v589_v44 = vadd.f32 %v588_v42, %v500_v41  ;;  %v501_v46 = vpop.f32.mrf.mxu1 }
  0xf3   : > { %v602_v48 = vadd.f32 %v601_v36, %v589_v44 }
  0xf5   : > { %v609_v49 = vadd.f32 %v1004_v47, %v602_v48 }
  0xf7   : > { %v613_v50 = vsel %vm612_vm1, %v609_v49, -1e+30 }
  0xf8   : > { %v590_v51 = vpop.f32.mrf.mxu2  ;;  %614 = vmax.xlane.f32.xlu0 %v613_v50 }
 0x16b   : > { %v615_v52 = vpop.xlane.xlu0 %614 }
 0x16c   : > { %v616_v53 = vsub.f32 %v613_v50, %v615_v52 }
 0x16e   : > { %v617_v54 = vmul.f32 1.442695, %v616_v53 }
 0x170   : > { %1005 = vpow2.f32 %v617_v54 }
 0x176   : > { %v1006_v55 = vpop.eup %1005 }
 0x177   : > { %619 = vadd.xlane.f32.xlu0 %v1006_v55 }
 0x1ea   : > { %v620_v56 = vpop.xlane.xlu0 %619 }
 0x1eb   : > { %1007 = vrcp.f32 %v620_v56  ;;  %v632_v60 = vand.u32 2147483648, %v620_v56  ;;  %v630_v62 = vand.u32 2147483647, %v620_v56  ;;  %vm626_vm3 = vweird.f32 %v620_v56 }
 0x1ed   : > { %v633_v0 = vor.u32 1.1754944e-38, %v632_v60  ;;  %vm631_vm5 = vcmp.eq.f32.partialorder %v630_v62, 8.507059e+37 }
 0x1f1   : > { %v1008_v57 = vpop.eup %1007 }
 0x1f2   : > { %v622_v58 = vmul.f32 %v1008_v57, %v620_v56  ;;  %vm627_vm2 = vweird.f32 %v1008_v57 }
 0x1f3   : > { %vm628_vm4 = vmor %vm626_vm3, %vm627_vm2 }
 0x1f4   : > { %v623_v59 = vsub.f32 1.0, %v622_v58 }
 0x1f6   : > { %v624_v61 = vmul.f32 %v1008_v57, %v623_v59 }
 0x1f8   : > { %v625_v63 = vadd.f32 %v1008_v57, %v624_v61 }
 0x1fa   : > { %v629_v1 = vsel %vm628_vm4, %v1008_v57, %v625_v63 }
 0x1fb   : > { %v634_v2 = vsel %vm631_vm5, %v633_v0, %v629_v1 }
 0x1fc   : > { %v635_v3 = vmul.f32 %v1006_v55, %v634_v2 }
 0x1fe   : > { %v636_v4 = vpack.c.bf16 %v635_v3, %v635_v3 }
 0x200   : > { %637 = vst [vmem:[%s315_s6] sm:$0xf] %v636_v4 }
 0x201   : > { %1156 = shalt.err (!%p1153_p10)
}
 0x202   : > { %942 = dma.vmem_to_hbm [thread:$0]  (%p1312_p4), %s652_s29, 64, %s654_s30, %s639_s25  }
 0x203 PF: > { %s665_s2 = sand.u32 1, %s1195_s18   ;;  %p1450_p11 = scmp.ge.s32.totalorder %s1207_s21, 2 }
 0x204   : > { %s666_s26 = scalar_lea.sflag [#allocation4], %s665_s2 }
 0x205   : > { %p959_p5 = pnand %p1450_p11, %p1316_p6 }
 0x207   : > { %p960_p13 = pneg %p959_p5 }
 0x209   : > { %1190 = dma.done.wait (%p960_p13), %s666_s26, 64  }
 0x20a   : > { %1192 = vsyncadd (%p960_p13), %s666_s26, 4294967232  ;;  %s1451_s15 = sld [smem:[#allocation16_spill]]  ;;  %p22_p0 = scmp.ge.s32.totalorder %s1286_s12, 4  }
 0x20b   : > { %s1452_s20 = sld [smem:[#allocation17_spill]]  ;;  %s1453_s18 = smov %s1199_s19 }
 0x20c   : > { %s1455_s21 = smov %s1286_s12  ;;  %24 = sbr.rel (!%p22_p0) target bundleno = 11 (0xb), region = 106 }
 0x210   : > { %s1454_s19 = smov %s1451_s15 }
 0x211   :  { %672 = vsyncpa [#allocation3], 1 }
 0x212   :  { %674 = vsyncpa [#allocation3 + $0x1], 1 }
 0x213   :  { %675 = vsyncpa [#allocation6], 1 }
 0x214   :  { %677 = vsyncpa [#allocation6 + $0x1], 1 }
 0x215   :  { %678 = vsyncpa [#allocation9], 1 }
 0x216   :  { %679 = vsyncpa [#allocation4], 1 }
 0x217   :  { %681 = vsyncpa [#allocation4 + $0x1], 1 }

</bundles_post_ra>
